<compile_context>
chip_gen: v7x
topology: tpu7x:2x2x1
jax: 0.10.0
libtpu: 0.0.40
codegen_flags: <defaults>
</compile_context>

<pallas_src>
import math

import jax
import jax.numpy as jnp
from jax.experimental import pallas as pl
from jax.experimental.pallas import tpu as pltpu


VGG_MEAN = jnp.array([0.485, 0.456, 0.406], dtype=jnp.float32)
VGG_STD = jnp.array([0.229, 0.224, 0.225], dtype=jnp.float32)


def _vgg_norm_kernel(x_ref, mean_ref, scale_ref, o_ref):
    # x: (tile_r, tile_c); mean/scale: (tile_r, 1) -> broadcast over lanes.
    x = x_ref[...].astype(jnp.float32)
    o_ref[...] = ((x - mean_ref[...]) * scale_ref[...]).astype(o_ref.dtype)


def _round_down(v, m):
    return (v // m) * m


def _round_up(v, m):
    return -(-v // m) * m


def vgg19_norm(
    img,
    mean=VGG_MEAN,
    std=VGG_STD,
    *,
    max_block_bytes=4 << 20,      # ~4 MiB input block (review: good on v6e,
                                  # fine on v5e/v7x with explicit vmem limit)
    vmem_limit_bytes=48 << 20,    # fits v7x (64 MiB phys) and v5e/v6e
    min_grid_steps=4,             # feed both v7x TensorCores
):
    """(img - mean) / std with per-channel mean/std, img in NCHW layout."""
    n, c, h, w = img.shape
    assert mean.shape == (c,) and std.shape == (c,)

    rows = n * c
    cols = h * w

    # ---- fold rows to a multiple of 8 when the spatial dim allows it ------
    fold = 1
    if rows % 8 != 0:
        need = 8 // math.gcd(rows, 8)
        if cols % need == 0:
            fold = need
    rows2 = rows * fold
    cols2 = cols // fold

    x2 = img.reshape(rows2, cols2)

    # PyTorch promotes (int - float)/float to float; mirror that.
    out_dtype = img.dtype if jnp.issubdtype(img.dtype, jnp.floating) else jnp.float32

    # Per-row constants: original row r -> channel r % C; folded row r2 maps
    # to original row r2 // fold.
    mean_per_row = jnp.tile(mean.astype(jnp.float32), n)          # (rows,)
    scale_per_row = jnp.tile(1.0 / std.astype(jnp.float32), n)    # (rows,)
    mean_rows = jnp.repeat(mean_per_row, fold).reshape(rows2, 1)
    scale_rows = jnp.repeat(scale_per_row, fold).reshape(rows2, 1)

    itemsize = jnp.dtype(img.dtype).itemsize

    # ---- column tile: lane-dense, 128-multiple, within the byte budget ----
    if cols2 >= 128:
        budget_c = max(128, _round_down(max_block_bytes // (8 * itemsize), 128))
        tile_c = min(_round_down(cols2, 128), budget_c)
    else:
        tile_c = cols2  # equals full dim -> layout-legal

    # ---- row tile: 8-multiple, remaining budget ---------------------------
    if rows2 >= 8:
        budget_r = max(8, _round_down(max_block_bytes // (tile_c * itemsize), 8))
        tile_r = min(_round_down(rows2, 8), budget_r)
    else:
        tile_r = rows2  # equals full dim -> layout-legal

    grid_r = pl.cdiv(rows2, tile_r)
    grid_c = pl.cdiv(cols2, tile_c)

    # ---- widen the grid (best effort) so v7x's 2 TCs both get work --------
    while grid_r * grid_c < min_grid_steps and tile_c > 128:
        tile_c = max(128, _round_up(tile_c // 2, 128))
        grid_c = pl.cdiv(cols2, tile_c)
    while grid_r * grid_c < min_grid_steps and tile_r > 8:
        tile_r = max(8, _round_up(tile_r // 2, 8))
        grid_r = pl.cdiv(rows2, tile_r)

    out2 = pl.pallas_call(
        _vgg_norm_kernel,
        out_shape=jax.ShapeDtypeStruct((rows2, cols2), out_dtype),
        grid=(grid_r, grid_c),
        in_specs=[
            pl.BlockSpec((tile_r, tile_c), lambda i, j: (i, j)),
            pl.BlockSpec((tile_r, 1), lambda i, j: (i, 0)),
            pl.BlockSpec((tile_r, 1), lambda i, j: (i, 0)),
        ],
        out_specs=pl.BlockSpec((tile_r, tile_c), lambda i, j: (i, j)),
        compiler_params=pltpu.CompilerParams(
            dimension_semantics=("parallel", "parallel"),
            vmem_limit_bytes=vmem_limit_bytes,
        ),
    )(x2, mean_rows, scale_rows)

    return out2.reshape(n, c, h, w)


if __name__ == "__main__":
    key = jax.random.PRNGKey(0)

    # Small NCHW image consistent with the module (3 channels for VGG norm).
    img = jax.random.uniform(key, (2, 3, 16, 16), dtype=jnp.float32)

    out = vgg19_norm(img)
    out = jax.block_until_ready(out)

    # Correctness check vs. pure-JAX reference of the PyTorch semantics.
    ref = (img - VGG_MEAN.reshape(1, 3, 1, 1)) / VGG_STD.reshape(1, 3, 1, 1)
    assert out.shape == img.shape and out.dtype == img.dtype
    assert jnp.allclose(out, ref, rtol=1e-5, atol=1e-5), (
        float(jnp.max(jnp.abs(out - ref)))
    )

    print("KERNEL_OK")
</pallas_src>

<mosaic_0001>
module attributes {stable_mosaic.version = 11 : i64} {
  func.func @_vgg_norm_kernel(%arg0: i32, %arg1: i32, %arg2: memref<8x64xf32, #tpu.memory_space<vmem>>, %arg3: memref<8x1xf32, #tpu.memory_space<vmem>>, %arg4: memref<8x1xf32, #tpu.memory_space<vmem>>, %arg5: memref<8x64xf32, #tpu.memory_space<vmem>>) attributes {dimension_semantics = [#tpu.dimension_semantics<parallel>, #tpu.dimension_semantics<parallel>], iteration_bounds = array<i64: 3, 1>, scalar_prefetch = 0 : i64, scratch_operands = 0 : i64, tpu.core_type = #tpu.core_type<tc>, window_params = [{transform_indices = @transform_0, window_bounds = array<i64: 8, 64>}, {transform_indices = @transform_1, window_bounds = array<i64: 8, 1>}, {transform_indices = @transform_2, window_bounds = array<i64: 8, 1>}, {transform_indices = @transform_3, window_bounds = array<i64: 8, 64>}]} {
    %c0 = arith.constant 0 : index
    %c0_0 = arith.constant 0 : index
    %0 = vector.load %arg2[%c0, %c0_0] : memref<8x64xf32, #tpu.memory_space<vmem>>, vector<8x64xf32>
    %c0_1 = arith.constant 0 : index
    %c0_2 = arith.constant 0 : index
    %1 = vector.load %arg3[%c0_1, %c0_2] : memref<8x1xf32, #tpu.memory_space<vmem>>, vector<8x1xf32>
    %2 = vector.broadcast %1 : vector<8x1xf32> to vector<8x64xf32>
    %3 = arith.subf %0, %2 : vector<8x64xf32>
    %c0_3 = arith.constant 0 : index
    %c0_4 = arith.constant 0 : index
    %4 = vector.load %arg4[%c0_3, %c0_4] : memref<8x1xf32, #tpu.memory_space<vmem>>, vector<8x1xf32>
    %5 = vector.broadcast %4 : vector<8x1xf32> to vector<8x64xf32>
    %6 = arith.mulf %3, %5 : vector<8x64xf32>
    %c0_5 = arith.constant 0 : index
    %c0_6 = arith.constant 0 : index
    %7 = vector.load %arg5[%c0_5, %c0_6] : memref<8x64xf32, #tpu.memory_space<vmem>>, vector<8x64xf32>
    tpu.vector_store %arg5[%c0_5, %c0_6], %6 {strides = array<i32>} : memref<8x64xf32, #tpu.memory_space<vmem>>, vector<8x64xf32>,
    return
  }
  func.func @transform_0(%arg0: i32, %arg1: i32) -> (i32, i32) {
    %c0_i32 = arith.constant 0 : i32
    return %arg0, %arg1 : i32, i32
  }
  func.func @transform_1(%arg0: i32, %arg1: i32) -> (i32, i32) {
    %c0_i32 = arith.constant 0 : i32
    %c0_i32_0 = arith.constant 0 : i32
    return %arg0, %c0_i32 : i32, i32
  }
  func.func @transform_2(%arg0: i32, %arg1: i32) -> (i32, i32) {
    %c0_i32 = arith.constant 0 : i32
    %c0_i32_0 = arith.constant 0 : i32
    return %arg0, %c0_i32 : i32, i32
  }
  func.func @transform_3(%arg0: i32, %arg1: i32) -> (i32, i32) {
    %c0_i32 = arith.constant 0 : i32
    return %arg0, %arg1 : i32, i32
  }
}

</mosaic_0001>

<bundles_post_ra>
// kernel: tpu_custom_call.1
= control target key start
LH: loop header
LB: loop body
LE: loop exit
PB: predicated region body
PF: predicated region fallthrough
CT: control target
= control target key end

     0   :  { %8 = vsyncpa [#allocation3], 0  ;;  %s642_s0 = inlined_call_operand.vmem [shape: f32[24,64], index: 0, kind: input, shape index: {}]   ;;  %s643_s1 = inlined_call_operand.vmem [shape: f32[24,1], index: 1, kind: input, shape index: {}]   ;;  %s644_s2 = inlined_call_operand.vmem [shape: f32[24,1], index: 2, kind: input, shape index: {}]   ;;  %s645_s3 = inlined_call_operand.hbm [shape: f32[24,64], index: 3, kind: output, shape index: {}]  }
   0x1   :  { %10 = vsyncpa [#allocation3 + $0x1], 0  ;;  %s524_s12 = smov 0   ;;  %s526_s13 = smov 0  }
   0x2   :  { %s528_s14 = smov 0   ;;  %s530_s15 = smov 0  }
   0x3   :  { %s532_s16 = smov 0   ;;  %s534_s17 = smov 0  }
   0x4 LB: > { %s352_s18 = sadd.s32 4294967295, %s500_s17   ;;  %s353_s19 = sadd.s32 4294967294, %s500_s17   ;;  %s500_s17 = sphi %s534_s17, %s16_s17   ;;  %s496_s16 = sphi %s532_s16, %s652_s16   ;;  %s492_s15 = sphi %s530_s15, %s651_s15   ;;  %s488_s14 = sphi %s528_s14, %s650_s14   ;;  %s484_s13 = sphi %s526_s13, %s649_s13   ;;  %s480_s12 = sphi %s524_s12, %s648_s12  }
   0x5   : > { %s28_s20 = sadd.s32 1, %s496_s16  ;;  %s117_s21 = sadd.s32 1, %s488_s14 }
   0x6   : > { %p30_p0 = scmp.ge.s32.totalorder %s28_s20, 3  ;;  %p127_p1 = scmp.ne.s32.totalorder %s488_s14, %s484_s13 }
   0x7   : > { %p128_p2 = scmp.eq.s32.totalorder %s352_s18, 2  ;;  %p133_p3 = scmp.ne.s32.totalorder %s484_s13, %s480_s12 }
   0x8   : > { %s654_s20 = smov (%p30_p0, %s28_s20), 0  ;;  %p134_p5 = scmp.eq.s32.totalorder %s353_s19, 2 }
   0x9   : > { %p564_p4 = por %p128_p2, %p127_p1  ;;  %s112_s23 = ssub.s32 %s496_s16, %s654_s20 }
   0xa   : > { %p356_p6 = scmp.ge.s32.totalorder %s500_s17, 1  ;;  %p115_p7 = scmp.eq.s32.totalorder %s112_s23, 0 }
   0xb   : > { %p571_p8 = por %p134_p5, %p133_p3  ;;  %p176_p9 = scmp.lt.s32.totalorder %s500_s17, 4 }
   0xc   : > { %s577_s25 = scalar_select %p115_p7, %s488_s14, %s117_s21  }
   0xd   : > { %p177_p10 = pnand %p356_p6, %p176_p9 }
   0xe   : > { %p210_p11 = scmp.lt.s32.totalorder (!%p177_p10), %s492_s15, 2  ;;  %v502_v0 = vmov (!%p177_p10), 0   ;;  %s207_s7 = sand.u32 (!%p177_p10), 1, %s484_s13   ;;  %vm240_vm0 = vcmask (!%p177_p10), 523264  }
   0xf   : > { %180 = sbr.rel (%p177_p10) target bundleno = 175 (0xaf), region = 32  ;;  %421 = vset.pattern.permute.xlu0 (!%p177_p10), %v502_v0  ;;  %s357_s8 = sshll.u32 (!%p177_p10), %s207_s7, 3 }
  0x10   : > { %s362_s18 = sshll.u32 (!%p177_p10), %s492_s15, 7  ;;  %s209_s19 = scalar_lea.vmem (!%p177_p10), [#allocation2], %s357_s8 }
  0x11   : > { %s257_s21 = sshll.u32 (!%p177_p10), %s209_s19, 4  ;;  %s595_s28 = scalar_lea.hbm (!%p177_p10), %s645_s3, %s362_s18  ;;  %s597_s21 = int_to_ptr.vmem [resolvable:$true] %s257_s21 }
  0x12   : > { %s422_s29 = scalar_lea.vmem (!%p177_p10), %s597_s21, 128 }
  0x13   : > { %p423_p12 = scmp.ne.s32.totalorder (!%p177_p10), %s597_s21, %s422_s29 }
  0x15   : > { %p424_p13 = pnand (!%p177_p10), %p423_p12, %p564_p4 }
  0x16   : > { %s211_s26 = scalar_select %p210_p11, %s492_s15, 2 }
  0x17   : > { %p425_p0 = pneg %p424_p13  ;;  %s503_s15 = smov [#allocation2]  }
  0x18   : > { %s358_s27 = sshll.u32 %s211_s26, 3 }
  0x19   : > { %s220_s30 = scalar_lea.vmem %s643_s1, %s358_s27  ;;  %s224_s6 = scalar_lea.vmem %s644_s2, %s358_s27 }
  0x1a   : > { %v226_v1 = vld [vmem:[%s220_s30] sm:$0xff]  ;;  %s216_s11 = scalar_lea.vmem %s642_s0, %s358_s27  ;;  %s243_s27 = scalar_lea.sflag [#allocation3], %s207_s7 }
  0x1b   : > { %229 = vperm.xlu0 %421, %v226_v1   ;;  %v233_v2 = vld [vmem:[%s224_s6] sm:$0xff]  ;;  %s426_s30 = sshll.u32 %s503_s15, 4  ;;  %s427_s30 = int_to_ptr.vmem [resolvable:$false] %s426_s30 }
  0x1c   : > { %v225_v4 = vld [vmem:[%s216_s11] sm:$0xff]  ;;  %s428_s4 = scalar_lea.vmem %s427_s30, 256  ;;  %p429_p1 = scmp.lt.s32.totalorder %s597_s21, %s427_s30 }
  0x1d   : > { %p430_p2 = scmp.lt.s32.totalorder %s428_s4, %s422_s29 }
  0x1f   : > { %236 = vperm.xlu0 %421, %v233_v2   ;;  %p431_p3 = por %p430_p2, %p429_p1 }
  0x21   : > { %p432_p5 = pnand %p431_p3, %p425_p0 }
  0x9a   : > { %v230_v3 = vpop.permute.xlu0 %229 }
  0x9b   : > { %v232_v5 = vsub.f32 %v225_v4, %v230_v3 }
  0x9e   : > { %v237_v6 = vpop.permute.xlu0 %236 }
  0x9f   : > { %v239_v7 = vmul.f32 %v237_v6, %v232_v5 }
  0xa1   : > { %241 = vst.msk [vmem:[%s209_s19] sm:$0xff] %vm240_vm0, %v239_v7 }
  0xa2   : > { %435 = shalt.err (!%p432_p5)
}
  0xa3   : > { %s436_s5 = scalar_lea.hbm %s595_s28, 128  ;;  %s440_s8 = scalar_lea.hbm %s645_s3, 384 }
  0xa4   : > { %p437_p6 = scmp.ne.s32.totalorder %s595_s28, %s436_s5  ;;  %p441_p10 = scmp.lt.u32.totalorder %s595_s28, %s645_s3 }
  0xa5   : > { %p442_p11 = scmp.lt.u32.totalorder %s440_s8, %s436_s5  ;;  %p444_p13 = scmp.lt.u32.totalorder %s436_s5, %s595_s28 }
  0xa6   : > { %p438_p7 = pnand %p437_p6, %p564_p4 }
  0xa7   : > { %p443_p12 = por %p442_p11, %p441_p10 }
  0xa8   : > { %p439_p9 = pneg %p438_p7 }
  0xa9   : > { %p445_p0 = por %p444_p13, %p443_p12 }
  0xab   : > { %p446_p1 = pnand %p445_p0, %p439_p9 }
  0xad   : > { %449 = shalt.err (!%p446_p1)
}
  0xae   : > { %365 = dma.vmem_to_hbm [thread:$0]  (%p564_p4), %s597_s21, 128, %s595_s28, %s243_s27  }
  0xaf PF: > { %p371_p2 = scmp.ge.s32.totalorder %s500_s17, 2  ;;  %s269_s11 = sand.u32 1, %s480_s12  }
  0xb0   : > { %s270_s18 = scalar_lea.sflag [#allocation3], %s269_s11 }
  0xb1   : > { %p368_p3 = pnand %p371_p2, %p571_p8 }
  0xb3   : > { %475 = dma.done.wait (!%p368_p3), %s270_s18, 128  }
  0xb4   : > { %477 = vsyncadd (!%p368_p3), %s270_s18, 4294967168  ;;  %s16_s17 = sadd.s32 1, %s500_s17   ;;  %s648_s12 = smov %s484_s13 }
  0xb5   : > { %p13_p5 = scmp.ge.s32.totalorder %s16_s17, 5   ;;  %s649_s13 = smov %s488_s14 }
  0xb6   : > { %s650_s14 = smov %s577_s25  ;;  %s651_s15 = smov %s496_s16 }
  0xb7   : > { %s652_s16 = smov %s654_s20  ;;  %15 = sbr.rel (!%p13_p5) target bundleno = 4 (0x4), region = 73 }
  0xbe   :  { %275 = vsyncpa [#allocation3], 1 }
  0xbf   :  { %277 = vsyncpa [#allocation3 + $0x1], 1 }

</bundles_post_ra>
